<compile_context>
chip_gen: v7x
topology: tpu7x:2x2x1
jax: 0.10.0
libtpu: 0.0.40
codegen_flags: <defaults>
</compile_context>

<pallas_src>
import jax
import jax.numpy as jnp
from jax import lax
from jax.experimental import pallas as pl
from jax.experimental.pallas import tpu as pltpu
from functools import partial


def _attention_kernel(x_ref, pol_ref, wq_ref, wk_ref, wv_ref, wp_ref, b_ref,
                      out_ref, acc_ref, *, num_heads, eps):
    h = pl.program_id(1)

    x = x_ref[0]                      # (N, C) bf16
    N = x.shape[0]

    wq = wq_ref[0]                    # (C, D) bf16   (softmax scale pre-folded)
    wk = wk_ref[0]                    # (C, D) bf16
    wv = wv_ref[0]                    # (C, D) bf16
    wp = wp_ref[0]                    # (D, C) bf16   (per-head slice of proj.T)

    # Per-head projections (bf16 operands, f32 accumulate on the MXU).
    q = jnp.dot(x, wq, preferred_element_type=jnp.float32).astype(jnp.bfloat16)
    k = jnp.dot(x, wk, preferred_element_type=jnp.float32).astype(jnp.bfloat16)
    v = jnp.dot(x, wv, preferred_element_type=jnp.float32).astype(jnp.bfloat16)

    # Scores: contract on D without materializing k.T (scale already in q).
    s = lax.dot_general(q, k, (((1,), (1,)), ((), ())),
                        preferred_element_type=jnp.float32)        # (N, N) f32

    # Policy mask: attn_policy[i, j] = 1 on the diagonal, else policy[j].
    pol_row = pol_ref[0]                                           # (1, N) f32
    row_ids = lax.broadcasted_iota(jnp.int32, (N, N), 0)
    col_ids = lax.broadcasted_iota(jnp.int32, (N, N), 1)
    attn_policy = jnp.where(row_ids == col_ids, jnp.float32(1.0), pol_row)

    # softmax_with_policy (f32; row max over unmasked scores, as in reference).
    m = jnp.max(s, axis=-1, keepdims=True)
    e = jnp.exp(s - m) * attn_policy
    denom = jnp.sum(e, axis=-1, keepdims=True)
    if eps:
        e = e + (eps / N)
        denom = denom + eps
    attn = e * pl.reciprocal(denom, approx=True)                   # (N, N) f32

    ctx = jnp.dot(attn.astype(jnp.bfloat16), v,
                  preferred_element_type=jnp.float32)              # (N, D) f32
    y_h = jnp.dot(ctx.astype(jnp.bfloat16), wp,
                  preferred_element_type=jnp.float32)              # (N, C) f32

    @pl.when(h == 0)
    def _():
        acc_ref[...] = jnp.zeros_like(acc_ref)

    acc_ref[...] += y_h

    @pl.when(h == num_heads - 1)
    def _():
        out_ref[0] = (acc_ref[...] + b_ref[...]).astype(out_ref.dtype)


def attention_pallas(x, policy, wqkv, wproj, bproj, *, num_heads, eps=0.0):
    """PiT Attention forward (inference path: softmax_with_policy with eps=0)."""
    B, N, C = x.shape
    D = C // num_heads
    scale = D ** (-0.5)
    out_dtype = x.dtype

    # ---- one-time layout prep (outside the kernel) ----------------------------
    # wqkv rows are ordered (3, H, D); make K-major per-head (C, D) blocks and
    # fold the softmax scale into the Q weight.
    w = wqkv.reshape(3, num_heads, D, C)                                     # (3,H,D,C)
    wq_t = (jnp.transpose(w[0], (0, 2, 1)) * scale).astype(jnp.bfloat16)     # (H,C,D)
    wk_t = jnp.transpose(w[1], (0, 2, 1)).astype(jnp.bfloat16)               # (H,C,D)
    wv_t = jnp.transpose(w[2], (0, 2, 1)).astype(jnp.bfloat16)               # (H,C,D)
    wp_t = jnp.transpose(wproj).reshape(num_heads, D, C).astype(jnp.bfloat16)  # (H,D,C)
    bias = bproj.reshape(1, C).astype(jnp.float32)

    x_bf = x.astype(jnp.bfloat16)
    pol_t = jnp.transpose(policy, (0, 2, 1)).astype(jnp.float32)             # (B,1,N)

    kernel = partial(_attention_kernel, num_heads=num_heads, eps=float(eps))

    return pl.pallas_call(
        kernel,
        out_shape=jax.ShapeDtypeStruct((B, N, C), out_dtype),
        grid_spec=pltpu.PrefetchScalarGridSpec(
            num_scalar_prefetch=0,
            grid=(B, num_heads),
            in_specs=[
                pl.BlockSpec((1, N, C), lambda b, h: (b, 0, 0)),    # x (bf16)
                pl.BlockSpec((1, 1, N), lambda b, h: (b, 0, 0)),    # policy (f32)
                pl.BlockSpec((1, C, D), lambda b, h: (h, 0, 0)),    # Wq (scaled)
                pl.BlockSpec((1, C, D), lambda b, h: (h, 0, 0)),    # Wk
                pl.BlockSpec((1, C, D), lambda b, h: (h, 0, 0)),    # Wv
                pl.BlockSpec((1, D, C), lambda b, h: (h, 0, 0)),    # Wproj per head
                pl.BlockSpec((1, C), lambda b, h: (0, 0)),          # proj bias
            ],
            out_specs=pl.BlockSpec((1, N, C), lambda b, h: (b, 0, 0)),
            scratch_shapes=[pltpu.VMEM((N, C), jnp.float32)],
        ),
        compiler_params=pltpu.CompilerParams(
            dimension_semantics=("parallel", "arbitrary"),
            vmem_limit_bytes=64 * 1024 * 1024,
        ),
    )(x_bf, pol_t, wq_t, wk_t, wv_t, wp_t, bias)


def attention_reference(x, policy, wqkv, wproj, bproj, *, num_heads, eps=0.0):
    """Pure-JAX f32 reference mirroring the PyTorch module (eval path)."""
    B, N, C = x.shape
    D = C // num_heads
    scale = D ** (-0.5)

    qkv = x @ wqkv.T                                        # (B, N, 3C)
    qkv = qkv.reshape(B, N, 3, num_heads, D).transpose(2, 0, 3, 1, 4)
    q, k, v = qkv[0], qkv[1], qkv[2]                        # (B, H, N, D)

    attn = jnp.einsum("bhnd,bhmd->bhnm", q, k) * scale      # (B, H, N, N)

    attn_policy = policy.reshape(B, 1, 1, N)
    eye = jnp.eye(N, dtype=attn_policy.dtype).reshape(1, 1, N, N)
    attn_policy = attn_policy + (1.0 - attn_policy) * eye
    max_att = jnp.max(attn, axis=-1, keepdims=True)
    attn = jnp.exp(attn - max_att) * attn_policy
    attn = (attn + eps / N) / (jnp.sum(attn, axis=-1, keepdims=True) + eps)

    ctx = jnp.einsum("bhnm,bhmd->bhnd", attn, v)            # (B, H, N, D)
    ctx = ctx.transpose(0, 2, 1, 3).reshape(B, N, C)
    return ctx @ wproj.T + bproj


if __name__ == "__main__":
    B, N, C = 2, 8, 32
    num_heads = 8

    key = jax.random.PRNGKey(0)
    kx, kp, kw1, kw2, kb = jax.random.split(key, 5)

    x = jax.random.normal(kx, (B, N, C), dtype=jnp.float32)
    # binary keep/drop policy in {0, 1}, shape (B, N, 1)
    policy = (jax.random.uniform(kp, (B, N, 1)) > 0.3).astype(jnp.float32)

    # Deterministic parameter init (nn.Linear shapes; qkv_bias=False)
    wqkv = 0.02 * jax.random.normal(kw1, (3 * C, C), dtype=jnp.float32)
    wproj = 0.02 * jax.random.normal(kw2, (C, C), dtype=jnp.float32)
    bproj = 0.02 * jax.random.normal(kb, (1, C), dtype=jnp.float32)

    out = attention_pallas(x, policy, wqkv, wproj, bproj,
                           num_heads=num_heads, eps=0.0)
    out = jax.block_until_ready(out)

    ref = attention_reference(x, policy, wqkv, wproj, bproj,
                              num_heads=num_heads, eps=0.0)
    # bf16 matmul operands => loosen tolerance vs f32 reference.
    assert jnp.allclose(out, ref, atol=1e-2, rtol=1e-2), "mismatch vs reference"

    print("KERNEL_OK")
</pallas_src>

<mosaic_0001>
module attributes {stable_mosaic.version = 11 : i64} {
  func.func @_attention_kernel(%arg0: i32, %arg1: i32, %arg2: memref<1x8x32xbf16, #tpu.memory_space<vmem>>, %arg3: memref<1x1x8xf32, #tpu.memory_space<vmem>>, %arg4: memref<1x32x4xbf16, #tpu.memory_space<vmem>>, %arg5: memref<1x32x4xbf16, #tpu.memory_space<vmem>>, %arg6: memref<1x32x4xbf16, #tpu.memory_space<vmem>>, %arg7: memref<1x4x32xbf16, #tpu.memory_space<vmem>>, %arg8: memref<1x32xf32, #tpu.memory_space<vmem>>, %arg9: memref<1x8x32xf32, #tpu.memory_space<vmem>>, %arg10: memref<8x32xf32, #tpu.memory_space<vmem>>) attributes {dimension_semantics = [#tpu.dimension_semantics<parallel>, #tpu.dimension_semantics<arbitrary>], iteration_bounds = array<i64: 2, 8>, scalar_prefetch = 0 : i64, scratch_operands = 1 : i64, tpu.core_type = #tpu.core_type<tc>, window_params = [{transform_indices = @transform_0, window_bounds = array<i64: 1, 8, 32>}, {transform_indices = @transform_1, window_bounds = array<i64: 1, 1, 8>}, {transform_indices = @transform_2, window_bounds = array<i64: 1, 32, 4>}, {transform_indices = @transform_3, window_bounds = array<i64: 1, 32, 4>}, {transform_indices = @transform_4, window_bounds = array<i64: 1, 32, 4>}, {transform_indices = @transform_5, window_bounds = array<i64: 1, 4, 32>}, {pipeline_mode = #tpu.pipeline_mode<synchronous>, transform_indices = @transform_6, window_bounds = array<i64: 1, 32>}, {transform_indices = @transform_7, window_bounds = array<i64: 1, 8, 32>}]} {
    %c0 = arith.constant 0 : index
    %c0_0 = arith.constant 0 : index
    %c0_1 = arith.constant 0 : index
    %0 = vector.load %arg2[%c0, %c0_0, %c0_1] : memref<1x8x32xbf16, #tpu.memory_space<vmem>>, vector<1x8x32xbf16>
    %1 = vector.shape_cast %0 : vector<1x8x32xbf16> to vector<8x32xbf16>
    %c0_2 = arith.constant 0 : index
    %c0_3 = arith.constant 0 : index
    %c0_4 = arith.constant 0 : index
    %2 = vector.load %arg4[%c0_2, %c0_3, %c0_4] : memref<1x32x4xbf16, #tpu.memory_space<vmem>>, vector<1x32x4xbf16>
    %3 = vector.shape_cast %2 : vector<1x32x4xbf16> to vector<32x4xbf16>
    %c0_5 = arith.constant 0 : index
    %c0_6 = arith.constant 0 : index
    %c0_7 = arith.constant 0 : index
    %4 = vector.load %arg5[%c0_5, %c0_6, %c0_7] : memref<1x32x4xbf16, #tpu.memory_space<vmem>>, vector<1x32x4xbf16>
    %5 = vector.shape_cast %4 : vector<1x32x4xbf16> to vector<32x4xbf16>
    %c0_8 = arith.constant 0 : index
    %c0_9 = arith.constant 0 : index
    %c0_10 = arith.constant 0 : index
    %6 = vector.load %arg6[%c0_8, %c0_9, %c0_10] : memref<1x32x4xbf16, #tpu.memory_space<vmem>>, vector<1x32x4xbf16>
    %7 = vector.shape_cast %6 : vector<1x32x4xbf16> to vector<32x4xbf16>
    %c0_11 = arith.constant 0 : index
    %c0_12 = arith.constant 0 : index
    %c0_13 = arith.constant 0 : index
    %8 = vector.load %arg7[%c0_11, %c0_12, %c0_13] : memref<1x4x32xbf16, #tpu.memory_space<vmem>>, vector<1x4x32xbf16>
    %9 = vector.shape_cast %8 : vector<1x4x32xbf16> to vector<4x32xbf16>
    %cst = arith.constant dense<0.000000e+00> : vector<8x4xf32>
    %10 = tpu.matmul %1, %3, %cst {dimension_numbers = #tpu.dot_dimension_numbers<[1], [0], [0], [1], [0, 0, 1, 1], [], []>} : vector<8x32xbf16>, vector<32x4xbf16>, vector<8x4xf32> -> vector<8x4xf32>
    %11 = arith.truncf %10 : vector<8x4xf32> to vector<8x4xbf16>
    %cst_14 = arith.constant dense<0.000000e+00> : vector<8x4xf32>
    %12 = tpu.matmul %1, %5, %cst_14 {dimension_numbers = #tpu.dot_dimension_numbers<[1], [0], [0], [1], [0, 0, 1, 1], [], []>} : vector<8x32xbf16>, vector<32x4xbf16>, vector<8x4xf32> -> vector<8x4xf32>
    %13 = arith.truncf %12 : vector<8x4xf32> to vector<8x4xbf16>
    %cst_15 = arith.constant dense<0.000000e+00> : vector<8x4xf32>
    %14 = tpu.matmul %1, %7, %cst_15 {dimension_numbers = #tpu.dot_dimension_numbers<[1], [0], [0], [1], [0, 0, 1, 1], [], []>} : vector<8x32xbf16>, vector<32x4xbf16>, vector<8x4xf32> -> vector<8x4xf32>
    %15 = arith.truncf %14 : vector<8x4xf32> to vector<8x4xbf16>
    %cst_16 = arith.constant dense<0.000000e+00> : vector<8x8xf32>
    %16 = tpu.matmul %11, %13, %cst_16 {dimension_numbers = #tpu.dot_dimension_numbers<[1], [1], [0], [0], [0, 0, 1, 0], [], []>} : vector<8x4xbf16>, vector<8x4xbf16>, vector<8x8xf32> -> vector<8x8xf32>
    %c0_17 = arith.constant 0 : index
    %c0_18 = arith.constant 0 : index
    %c0_19 = arith.constant 0 : index
    %17 = vector.load %arg3[%c0_17, %c0_18, %c0_19] : memref<1x1x8xf32, #tpu.memory_space<vmem>>, vector<1x1x8xf32>
    %18 = vector.shape_cast %17 : vector<1x1x8xf32> to vector<1x8xf32>
    %19 = tpu.iota {dimensions = array<i32: 0>} : vector<8x8xi32>
    %20 = tpu.iota {dimensions = array<i32: 1>} : vector<8x8xi32>
    %21 = arith.cmpi eq, %19, %20 : vector<8x8xi32>
    %cst_20 = arith.constant 1.000000e+00 : f32
    %22 = vector.broadcast %cst_20 : f32 to vector<8x8xf32>
    %23 = vector.shape_cast %18 : vector<1x8xf32> to vector<1x8xf32>
    %24 = vector.broadcast %23 : vector<1x8xf32> to vector<8x8xf32>
    %25 = arith.select %21, %22, %24 : vector<8x8xi1>, vector<8x8xf32>
    %cst_21 = arith.constant dense<0xFF800000> : vector<8xf32>
    %26 = vector.multi_reduction <maximumf>, %16, %cst_21 [1] : vector<8x8xf32> to vector<8xf32>
    %27 = vector.shape_cast %26 : vector<8xf32> to vector<8x1xf32>
    %28 = vector.broadcast %27 : vector<8x1xf32> to vector<8x8xf32>
    %29 = arith.subf %16, %28 : vector<8x8xf32>
    %30 = math.exp %29 : vector<8x8xf32>
    %31 = arith.mulf %30, %25 : vector<8x8xf32>
    %cst_22 = arith.constant dense<0.000000e+00> : vector<8xf32>
    %32 = vector.multi_reduction <add>, %31, %cst_22 [1] : vector<8x8xf32> to vector<8xf32>
    %33 = vector.shape_cast %32 : vector<8xf32> to vector<8x1xf32>
    %34 = tpu.reciprocal %33 {approx = true} : vector<8x1xf32> -> vector<8x1xf32>
    %35 = vector.broadcast %34 : vector<8x1xf32> to vector<8x8xf32>
    %36 = arith.mulf %31, %35 : vector<8x8xf32>
    %37 = arith.truncf %36 : vector<8x8xf32> to vector<8x8xbf16>
    %cst_23 = arith.constant dense<0.000000e+00> : vector<8x4xf32>
    %38 = tpu.matmul %37, %15, %cst_23 {dimension_numbers = #tpu.dot_dimension_numbers<[1], [0], [0], [1], [0, 0, 1, 1], [], []>} : vector<8x8xbf16>, vector<8x4xbf16>, vector<8x4xf32> -> vector<8x4xf32>
    %39 = arith.truncf %38 : vector<8x4xf32> to vector<8x4xbf16>
    %cst_24 = arith.constant dense<0.000000e+00> : vector<8x32xf32>
    %40 = tpu.matmul %39, %9, %cst_24 {dimension_numbers = #tpu.dot_dimension_numbers<[1], [0], [0], [1], [0, 0, 1, 1], [], []>} : vector<8x4xbf16>, vector<4x32xbf16>, vector<8x32xf32> -> vector<8x32xf32>
    %c0_i32 = arith.constant 0 : i32
    %41 = arith.cmpi eq, %arg1, %c0_i32 : i32
    %42 = arith.extui %41 : i1 to i32
    %c0_i32_25 = arith.constant 0 : i32
    %43 = arith.cmpi ne, %42, %c0_i32_25 : i32
    scf.if %43 {
      %cst_31 = arith.constant 0.000000e+00 : f32
      %50 = vector.broadcast %cst_31 : f32 to vector<8x32xf32>
      %c0_32 = arith.constant 0 : index
      %c0_33 = arith.constant 0 : index
      %51 = vector.load %arg10[%c0_32, %c0_33] : memref<8x32xf32, #tpu.memory_space<vmem>>, vector<8x32xf32>
      tpu.vector_store %arg10[%c0_32, %c0_33], %50 {strides = array<i32>} : memref<8x32xf32, #tpu.memory_space<vmem>>, vector<8x32xf32>,
    } else {
    }
    %c0_26 = arith.constant 0 : index
    %c0_27 = arith.constant 0 : index
    %44 = vector.load %arg10[%c0_26, %c0_27] : memref<8x32xf32, #tpu.memory_space<vmem>>, vector<8x32xf32>
    %45 = arith.addf %44, %40 : vector<8x32xf32>
    %c0_28 = arith.constant 0 : index
    %c0_29 = arith.constant 0 : index
    %46 = vector.load %arg10[%c0_28, %c0_29] : memref<8x32xf32, #tpu.memory_space<vmem>>, vector<8x32xf32>
    tpu.vector_store %arg10[%c0_28, %c0_29], %45 {strides = array<i32>} : memref<8x32xf32, #tpu.memory_space<vmem>>, vector<8x32xf32>,
    %c7_i32 = arith.constant 7 : i32
    %47 = arith.cmpi eq, %arg1, %c7_i32 : i32
    %48 = arith.extui %47 : i1 to i32
    %c0_i32_30 = arith.constant 0 : i32
    %49 = arith.cmpi ne, %48, %c0_i32_30 : i32
    scf.if %49 {
      %c0_31 = arith.constant 0 : index
      %c0_32 = arith.constant 0 : index
      %50 = vector.load %arg10[%c0_31, %c0_32] : memref<8x32xf32, #tpu.memory_space<vmem>>, vector<8x32xf32>
      %c0_33 = arith.constant 0 : index
      %c0_34 = arith.constant 0 : index
      %51 = vector.load %arg8[%c0_33, %c0_34] : memref<1x32xf32, #tpu.memory_space<vmem>>, vector<1x32xf32>
      %52 = vector.broadcast %51 : vector<1x32xf32> to vector<8x32xf32>
      %53 = arith.addf %50, %52 : vector<8x32xf32>
      %c0_35 = arith.constant 0 : index
      %c0_36 = arith.constant 0 : index
      %c0_37 = arith.constant 0 : index
      %54 = vector.load %arg9[%c0_35, %c0_36, %c0_37] : memref<1x8x32xf32, #tpu.memory_space<vmem>>, vector<1x8x32xf32>
      %55 = vector.shape_cast %54 : vector<1x8x32xf32> to vector<8x32xf32>
      %56 = vector.shape_cast %53 : vector<8x32xf32> to vector<1x8x32xf32>
      tpu.vector_store %arg9[%c0_35, %c0_36, %c0_37], %56 {strides = array<i32>} : memref<1x8x32xf32, #tpu.memory_space<vmem>>, vector<1x8x32xf32>,
    } else {
    }
    return
  }
  func.func @transform_0(%arg0: i32, %arg1: i32) -> (i32, i32, i32) {
    %c0_i32 = arith.constant 0 : i32
    %c0_i32_0 = arith.constant 0 : i32
    %c0_i32_1 = arith.constant 0 : i32
    return %arg0, %c0_i32, %c0_i32_0 : i32, i32, i32
  }
  func.func @transform_1(%arg0: i32, %arg1: i32) -> (i32, i32, i32) {
    %c0_i32 = arith.constant 0 : i32
    %c0_i32_0 = arith.constant 0 : i32
    %c0_i32_1 = arith.constant 0 : i32
    return %arg0, %c0_i32, %c0_i32_0 : i32, i32, i32
  }
  func.func @transform_2(%arg0: i32, %arg1: i32) -> (i32, i32, i32) {
    %c0_i32 = arith.constant 0 : i32
    %c0_i32_0 = arith.constant 0 : i32
    %c0_i32_1 = arith.constant 0 : i32
    return %arg1, %c0_i32, %c0_i32_0 : i32, i32, i32
  }
  func.func @transform_3(%arg0: i32, %arg1: i32) -> (i32, i32, i32) {
    %c0_i32 = arith.constant 0 : i32
    %c0_i32_0 = arith.constant 0 : i32
    %c0_i32_1 = arith.constant 0 : i32
    return %arg1, %c0_i32, %c0_i32_0 : i32, i32, i32
  }
  func.func @transform_4(%arg0: i32, %arg1: i32) -> (i32, i32, i32) {
    %c0_i32 = arith.constant 0 : i32
    %c0_i32_0 = arith.constant 0 : i32
    %c0_i32_1 = arith.constant 0 : i32
    return %arg1, %c0_i32, %c0_i32_0 : i32, i32, i32
  }
  func.func @transform_5(%arg0: i32, %arg1: i32) -> (i32, i32, i32) {
    %c0_i32 = arith.constant 0 : i32
    %c0_i32_0 = arith.constant 0 : i32
    %c0_i32_1 = arith.constant 0 : i32
    return %arg1, %c0_i32, %c0_i32_0 : i32, i32, i32
  }
  func.func @transform_6(%arg0: i32, %arg1: i32) -> (i32, i32) {
    %c0_i32 = arith.constant 0 : i32
    %c0_i32_0 = arith.constant 0 : i32
    %c0_i32_1 = arith.constant 0 : i32
    return %c0_i32, %c0_i32_0 : i32, i32
  }
  func.func @transform_7(%arg0: i32, %arg1: i32) -> (i32, i32, i32) {
    %c0_i32 = arith.constant 0 : i32
    %c0_i32_0 = arith.constant 0 : i32
    %c0_i32_1 = arith.constant 0 : i32
    return %arg0, %c0_i32, %c0_i32_0 : i32, i32, i32
  }
}

</mosaic_0001>

<bundles_post_ra>
// kernel: tpu_custom_call.1
= control target key start
LH: loop header
LB: loop body
LE: loop exit
PB: predicated region body
PF: predicated region fallthrough
CT: control target
= control target key end

     0   :  { %s2260_s0 = inlined_call_operand.hbm [shape: bf16[2,8,32], index: 0, kind: input, shape index: {}]   ;;  %s2261_s1 = inlined_call_operand.hbm [shape: f32[2,1,8], index: 1, kind: input, shape index: {}]   ;;  %s2262_s2 = inlined_call_operand.hbm [shape: bf16[8,32,4], index: 2, kind: input, shape index: {}]   ;;  %s2263_s3 = inlined_call_operand.hbm [shape: bf16[8,32,4], index: 3, kind: input, shape index: {}]   ;;  %s2264_s4 = inlined_call_operand.hbm [shape: bf16[8,32,4], index: 4, kind: input, shape index: {}]   ;;  %s2265_s5 = inlined_call_operand.hbm [shape: bf16[8,4,32], index: 5, kind: input, shape index: {}]   ;;  %s2266_s6 = inlined_call_operand.hbm [shape: f32[1,32], index: 6, kind: input, shape index: {}]   ;;  %s2267_s7 = inlined_call_operand.hbm [shape: f32[2,8,32], index: 7, kind: output, shape index: {}]  }
   0x1   :  { %2297 = sst [smem:[#allocation37_spill]] %s2261_s1 }
   0x2   :  { %2298 = sst [smem:[#allocation38_spill]] %s2263_s3 }
   0x3   :  { %2299 = sst [smem:[#allocation39_spill]] %s2266_s6 }
   0x4   :  { %2300 = sst [smem:[#allocation40_spill]] %s2267_s7 }
   0x5   :  { %12 = vsyncpa [#allocation4], 0 }
   0x6   :  { %14 = vsyncpa [#allocation4 + $0x1], 0 }
   0x7   :  { %15 = vsyncpa [#allocation7], 0 }
   0x8   :  { %17 = vsyncpa [#allocation7 + $0x1], 0 }
   0x9   :  { %18 = vsyncpa [#allocation10], 0 }
   0xa   :  { %20 = vsyncpa [#allocation10 + $0x1], 0 }
   0xb   :  { %21 = vsyncpa [#allocation13], 0 }
   0xc   :  { %23 = vsyncpa [#allocation13 + $0x1], 0 }
   0xd   :  { %24 = vsyncpa [#allocation5], 0 }
   0xe   :  { %26 = vsyncpa [#allocation5 + $0x1], 0  ;;  %s1747_s24 = smov 0   ;;  %s1749_s25 = smov 0  }
   0xf   :  { %s1751_s26 = smov 0   ;;  %s1753_s27 = smov 0  }
  0x10   :  { %s1755_s28 = smov 0   ;;  %s1757_s29 = smov 0  }
  0x11   :  { %s1759_s30 = smov 0   ;;  %s1761_s8 = smov 0  }
  0x12   :  { %s1763_s9 = smov 0   ;;  %s1765_s10 = smov 0  }
  0x13   :  { %s1767_s11 = smov 0  }
  0x14 LB: > { %2301 = sst [smem:[#allocation23_spill]] %s1656_s25  ;;  %s1801_s12 = sadd.s32 4294967295, %s1692_s11   ;;  %s1692_s11 = sphi %s1767_s11, %s32_s11   ;;  %s1688_s10 = sphi %s1765_s10, %s2372_s10   ;;  %s1684_s9 = sphi %s1763_s9, %s2371_s9   ;;  %s1680_s8 = sphi %s1761_s8, %s2370_s8   ;;  %s1676_s30 = sphi %s1759_s30, %s2369_s30   ;;  %s1672_s29 = sphi %s1757_s29, %s2362_s29   ;;  %s1668_s28 = sphi %s1755_s28, %s2368_s28   ;;  %s1664_s27 = sphi %s1753_s27, %s2367_s27   ;;  %s1660_s26 = sphi %s1751_s26, %s2366_s26   ;;  %s1656_s25 = sphi %s1749_s25, %s2365_s25   ;;  %s1652_s24 = sphi %s1747_s24, %s2359_s24  }
  0x15   : > { %2302 = sst [smem:[#allocation24_spill]] %s1664_s27  ;;  %s1083_s13 = sadd.s32 4294967294, %s1692_s11  }
  0x16   : > { %2303 = sst [smem:[#allocation25_spill]] %s1672_s29  ;;  %p64_p0 = scmp.ne.s32.totalorder %s1668_s28, %s1664_s27 }
  0x17   : > { %2304 = sst [smem:[#allocation26_spill]] %s1676_s30  ;;  %p2271_p1 = scmp.eq.s32.totalorder %s1801_s12, 0 }
  0x18   : > { %2305 = sst [smem:[#allocation27_spill]] %s1680_s8  ;;  %p116_p4 = scmp.ne.s32.totalorder %s1656_s25, %s1652_s24 }
  0x19   : > { %2306 = sst [smem:[#allocation28_spill]] %s1692_s11  ;;  %p1812_p3 = por %p2271_p1, %p64_p0 }
  0x1a   : > { %2307 = sst [smem:[#allocation29_spill]] %s1801_s12  ;;  %p245_p6 = scmp.eq.s32.totalorder %s1083_s13, 15 }
  0x1b   : > { %s2308_s15 = scalar_select %p1812_p3, 1, 0 }
  0x1c   : > { %p1820_p7 = por %p116_p4, %p2271_p1  ;;  %p1084_p8 = scmp.ge.s32.totalorder %s1692_s11, 1 }
  0x1d   : > { %p1825_p9 = por %p245_p6, %p64_p0  ;;  %p252_p10 = scmp.lt.s32.totalorder %s1692_s11, 17 }
  0x1e   : > { %s2309_s16 = scalar_select %p1820_p7, 1, 0 }
  0x1f   : > { %s2311_s17 = scalar_select %p1825_p9, 1, 0 }
  0x20   : > { %2310 = sst [smem:[#allocation30_spill]] %s2309_s16  ;;  %p1830_p11 = pnand %p1084_p8, %p252_p10 }
  0x21   : > { %2312 = sst [smem:[#allocation31_spill]] %s2311_s17  ;;  %s1694_s19 = smov [#allocation14]  }
  0x22   : > { %s2313_s18 = scalar_select %p1830_p11, 1, 0 }
  0x23   : > { %s265_s20 = sshll.u32 %s1694_s19, 4  ;;  %p1207_p12 = pneg %p1830_p11  ;;  %s266_s20 = int_to_ptr.vmem [resolvable:$true] %s265_s20 }
  0x24   : > { %s41_s22 = sadd.s32 1, %s1684_s9  ;;  %s2315_s6 = sld [smem:[#allocation39_spill]] }
  0x25   : > { %p1838_p13 = pnand %p1207_p12, %p2271_p1 }
  0x27   : > { %p1344_p4 = pneg %p1838_p13 }
  0x2a   : > { %s1342_s13 = scalar_lea.hbm %s2315_s6, 16 }
  0x2b   : > { %p1343_p0 = scmp.ne.s32.totalorder %s2315_s6, %s1342_s13  ;;  %p1349_p10 = scmp.lt.u32.totalorder %s1342_s13, %s2315_s6 }
  0x2d   : > { %p1345_p6 = pnand %p1344_p4, %p1343_p0 }
  0x2f   : > { %p1346_p8 = pneg %p1345_p6 }
  0x31   : > { %p1351_p12 = pnand %p1349_p10, %p1346_p8 }
  0x33   : > { %1354 = shalt.err (!%p1351_p12)
}
  0x34   : > { %s1355_s7 = scalar_lea.vmem %s266_s20, 16  ;;  %s1362_s23 = scalar_lea.vmem %s266_s20, 32 }
  0x35   : > { %p1356_p1 = scmp.ne.s32.totalorder %s266_s20, %s1355_s7  ;;  %p1363_p9 = scmp.lt.s32.totalorder %s266_s20, %s266_s20 }
  0x36   : > { %p1364_p7 = scmp.lt.s32.totalorder %s1362_s23, %s1355_s7 }
  0x37   : > { %p1358_p5 = pnand %p1356_p1, %p1344_p4 }
  0x38   : > { %p1365_p3 = por %p1364_p7, %p1363_p9 }
  0x39   : > { %p1359_p2 = pneg %p1358_p5 }
  0x3b   : > { %p1366_p11 = pnand %p1365_p3, %p1359_p2 }
  0x3d   : > { %1369 = shalt.err (!%p1366_p11)
}
  0x3e   : > { %1210 = dma.hbm_to_vmem [thread:$0]  (!%p1838_p13), %s2315_s6, 16, %s266_s20, [#allocation13]  }
  0x3f   : > { %p42_p1 = scmp.ge.s32.totalorder %s41_s22, 8  ;;  %s44_s7 = sadd.s32 1, %s1688_s10 }
  0x40   : > { %s51_s27 = sadd.s32 1, %s1672_s29  ;;  %p58_p2 = scmp.ne.s32.totalorder %s1672_s29, %s1668_s28 }
  0x41   : > { %s2374_s22 = smov (%p42_p1, %s41_s22), 0  ;;  %s2376_s7 = smov (!%p42_p1, %s44_s7), %s1688_s10 }
  0x42   : > { %2316 = sst [smem:[#allocation32_spill]] %s2374_s22  ;;  %p59_p3 = scmp.eq.s32.totalorder %s1692_s11, 0 }
  0x43   : > { %s100_s21 = ssub.s32 %s1684_s9, %s2374_s22  ;;  %p46_p5 = scmp.ge.s32.totalorder %s2376_s7, 2 }
  0x44   : > { %p101_p7 = scmp.eq.s32.totalorder %s100_s21, 0  ;;  %p60_p9 = por %p59_p3, %p58_p2 }
  0x45   : > { %p2317_p11 = scmp.ne.s32.totalorder %s1660_s26, %s1656_s25  ;;  %s2378_s7 = smov (%p46_p5, %s2376_s7), 0 }
  0x46   : > { %2319 = sst [smem:[#allocation33_spill]] %s2378_s7  ;;  %s2320_s24 = sadd.s32 1, %s1660_s26 }
  0x47   : > { %p1872_p13 = por %p2317_p11, %p59_p3  ;;  %s48_s19 = ssub.s32 %s1688_s10, %s2378_s7 }
  0x48   : > { %s1881_s13 = scalar_select %p101_p7, %s1660_s26, %s2320_s24  }
  0x49   : > { %p2322_p0 = scmp.eq.s32.totalorder %s1801_s12, 15  ;;  %p49_p6 = scmp.eq.s32.totalorder %s48_s19, 0 }
  0x4a   : > { %2321 = sst [smem:[#allocation34_spill]] %s1881_s13  ;;  %p1235_p8 = scmp.lt.s32.totalorder %s1692_s11, 16 }
  0x4b   : > { %p1887_p4 = por %p2322_p0, %p58_p2  ;;  %s1893_s14 = sand.u32 1, %s1672_s29  }
  0x4c   : > { %s1896_s17 = sand.u32 1, %s1692_s11   ;;  %p1901_p10 = pnand %p1235_p8, %p60_p9 }
  0x4d   : > { %s2323_s23 = scalar_select %p1887_p4, 1, 0 }
  0x4e   : > { %s1899_s21 = scalar_select %p49_p6, %s1672_s29, %s51_s27  }
  0x4f   : > { %2324 = sst [smem:[#allocation35_spill]] %s2323_s23  ;;  %s1089_s24 = sshll.u32 %s1688_s10, 4 }
  0x50   : > { %2325 = sst [smem:[#allocation36_spill]] %s1899_s21  ;;  %s2327_s1 = sld [smem:[#allocation37_spill]] }
  0x51   : > { %s2326_s6 = scalar_select %p1901_p10, 1, 0 }
  0x52   : > { %s297_s13 = scalar_lea.vmem [#allocation6], %s1893_s14  ;;  %p1914_p12 = pnand %p1235_p8, %p1872_p13 }
  0x53   : > { %s304_s11 = sshll.u32 %s297_s13, 4  ;;  %p2284_p2 = pneg %p1901_p10  ;;  %s1918_s11 = int_to_ptr.vmem [resolvable:$true] %s304_s11 }
  0x54   : > { %s2328_s27 = scalar_select %p1914_p12, 1, 0 }
  0x56   : > { %s1909_s19 = scalar_lea.hbm %s2327_s1, %s1089_s24  ;;  %s1375_s13 = scalar_lea.hbm %s2327_s1, 32 }
  0x57   : > { %s1370_s29 = scalar_lea.hbm %s1909_s19, 16  ;;  %p1376_p7 = scmp.lt.u32.totalorder %s1909_s19, %s2327_s1 }
  0x58   : > { %p1371_p1 = scmp.ne.s32.totalorder %s1909_s19, %s1370_s29  ;;  %p1377_p9 = scmp.lt.u32.totalorder %s1375_s13, %s1370_s29 }
  0x59   : > { %p1379_p13 = scmp.lt.u32.totalorder %s1370_s29, %s1909_s19 }
  0x5a   : > { %p1373_p3 = pnand %p2284_p2, %p1371_p1  ;;  %p1378_p11 = por %p1377_p9, %p1376_p7 }
  0x5c   : > { %p1374_p5 = pneg %p1373_p3  ;;  %p1380_p0 = por %p1379_p13, %p1378_p11 }
  0x5e   : > { %p1381_p6 = pnand %p1380_p0, %p1374_p5 }
  0x60   : > { %1384 = shalt.err (!%p1381_p6)
}
  0x61   : > { %s1385_s21 = scalar_lea.vmem %s1918_s11, 16  ;;  %s1695_s22 = smov [#allocation6]  }
  0x62   : > { %p1386_p8 = scmp.ne.s32.totalorder %s1918_s11, %s1385_s21  ;;  %s1390_s7 = sshll.u32 %s1695_s22, 4  ;;  %s1391_s7 = int_to_ptr.vmem [resolvable:$false] %s1390_s7 }
  0x63   : > { %s1392_s20 = scalar_lea.vmem %s1391_s7, 32  ;;  %p1393_p4 = scmp.lt.s32.totalorder %s1918_s11, %s1391_s7 }
  0x64   : > { %p1388_p1 = pnand %p1386_p8, %p2284_p2  ;;  %p1394_p7 = scmp.lt.s32.totalorder %s1392_s20, %s1385_s21 }
  0x66   : > { %p1389_p3 = pneg %p1388_p1  ;;  %p1395_p9 = por %p1394_p7, %p1393_p4 }
  0x68   : > { %p1396_p11 = pnand %p1395_p9, %p1389_p3 }
  0x6a   : > { %1399 = shalt.err (!%p1396_p11)
}
  0x6b   : > { %s2329_s29 = scalar_lea.sflag [#allocation7], %s1896_s17  ;;  %s2283_s13 = sand.u32 1, %s1660_s26  }
  0x6c   : > { %1217 = dma.hbm_to_vmem [thread:$0]  (!%p1901_p10), %s1909_s19, 16, %s1918_s11, %s2329_s29  }
  0x6d   : > { %s1951_s24 = sshll.u32 %s2283_s13, 4  ;;  %s1954_s21 = sshll.u32 %s1684_s9, 8 }
  0x6e   : > { %s2330_s3 = sld [smem:[#allocation38_spill]]  ;;  %s336_s1 = scalar_lea.vmem [#allocation9], %s1951_s24 }
  0x6f   : > { %s343_s23 = sshll.u32 %s336_s1, 4  ;;  %s333_s19 = scalar_lea.sflag [#allocation10], %s1896_s17  ;;  %s1963_s23 = int_to_ptr.vmem [resolvable:$true] %s343_s23 }
  0x70   : > { %p1971_p5 = pneg %p1914_p12 }
  0x72   : > { %s2331_s13 = scalar_select %p1971_p5, 1, 0 }
  0x74   : > { %s1960_s20 = scalar_lea.hbm %s2330_s3, %s1954_s21  ;;  %s1405_s8 = scalar_lea.hbm %s2330_s3, 2048 }
  0x75   : > { %s1400_s29 = scalar_lea.hbm %s1960_s20, 256  ;;  %p1406_p6 = scmp.lt.u32.totalorder %s1960_s20, %s2330_s3 }
  0x76   : > { %p1401_p4 = scmp.ne.s32.totalorder %s1960_s20, %s1400_s29  ;;  %p1407_p8 = scmp.lt.u32.totalorder %s1405_s8, %s1400_s29 }
  0x77   : > { %p1409_p3 = scmp.lt.u32.totalorder %s1400_s29, %s1960_s20 }
  0x78   : > { %p1403_p13 = pnand %p1971_p5, %p1401_p4  ;;  %p1408_p1 = por %p1407_p8, %p1406_p6 }
  0x7a   : > { %p1404_p0 = pneg %p1403_p13  ;;  %p1410_p7 = por %p1409_p3, %p1408_p1 }
  0x7c   : > { %p1411_p9 = pnand %p1410_p7, %p1404_p0 }
  0x7e   : > { %1414 = shalt.err (!%p1411_p9)
}
  0x7f   : > { %s1415_s11 = scalar_lea.vmem %s1963_s23, 256  ;;  %s1696_s22 = smov [#allocation9]  }
  0x80   : > { %p1416_p11 = scmp.ne.s32.totalorder %s1963_s23, %s1415_s11  ;;  %s1420_s7 = sshll.u32 %s1696_s22, 4  ;;  %s1421_s7 = int_to_ptr.vmem [resolvable:$false] %s1420_s7 }
  0x81   : > { %s1422_s30 = scalar_lea.vmem %s1421_s7, 512  ;;  %p1423_p2 = scmp.lt.s32.totalorder %s1963_s23, %s1421_s7 }
  0x82   : > { %p1418_p4 = pnand %p1416_p11, %p1971_p5  ;;  %p1424_p10 = scmp.lt.s32.totalorder %s1422_s30, %s1415_s11 }
  0x84   : > { %p1419_p13 = pneg %p1418_p4  ;;  %p1425_p6 = por %p1424_p10, %p1423_p2 }
  0x86   : > { %p1426_p8 = pnand %p1425_p6, %p1419_p13 }
  0x88   : > { %1429 = shalt.err (!%p1426_p8)
}
  0x89   : > { %s1697_s8 = smov 64   ;;  %s1698_s29 = smov 4  }
  0x8a   : > { %1223 = dma.hbm_to_vmem [thread:$0]  (!%p1914_p12), %s1960_s20, 256, %s1963_s23, %s333_s19, %s1697_s8, %s1697_s8, %s1698_s29  }
  0x8b   : > { %s1088_s11 = sshll.u32 %s1688_s10, 6  ;;  %s2332_s30 = sshll.u32 %s1893_s14, 2 }
  0x8c   : > { %s2003_s7 = scalar_lea.hbm %s2260_s0, %s1088_s11  ;;  %s280_s3 = scalar_lea.vmem [#allocation3], %s2332_s30 }
  0x8d   : > { %s287_s16 = sshll.u32 %s280_s3, 4  ;;  %s277_s25 = scalar_lea.sflag [#allocation4], %s1893_s14  ;;  %s288_s16 = int_to_ptr.vmem [resolvable:$true] %s287_s16 }
  0x8e   : > { %s1430_s12 = scalar_lea.hbm %s2003_s7, 64  ;;  %p2333_p2 = scmp.ne.s32.totalorder %s2326_s6, 0 }
  0x8f   : > { %p1431_p10 = scmp.ne.s32.totalorder %s2003_s7, %s1430_s12  ;;  %s1435_s11 = scalar_lea.hbm %s2260_s0, 128 }
  0x90   : > { %p2334_p0 = pneg %p2333_p2  ;;  %p1436_p7 = scmp.lt.u32.totalorder %s2003_s7, %s2260_s0 }
  0x91   : > { %p1437_p9 = scmp.lt.u32.totalorder %s1435_s11, %s1430_s12  ;;  %p1439_p4 = scmp.lt.u32.totalorder %s1430_s12, %s2003_s7 }
  0x92   : > { %p1433_p1 = pnand %p1431_p10, %p2334_p0 }
  0x93   : > { %p1438_p11 = por %p1437_p9, %p1436_p7 }
  0x94   : > { %p1434_p3 = pneg %p1433_p1 }
  0x95   : > { %p1440_p13 = por %p1439_p4, %p1438_p11 }
  0x97   : > { %p1441_p6 = pnand %p1440_p13, %p1434_p3 }
  0x99   : > { %1444 = shalt.err (!%p1441_p6)
}
  0x9a   : > { %s1445_s3 = scalar_lea.vmem %s288_s16, 64  ;;  %p2335_p10 = pmov %p2334_p0 }
  0x9b   : > { %p1446_p8 = scmp.ne.s32.totalorder %s288_s16, %s1445_s3  ;;  %s1699_s14 = smov [#allocation3]  }
  0x9c   : > { %s1450_s30 = sshll.u32 %s1699_s14, 4  ;;  %s1451_s30 = int_to_ptr.vmem [resolvable:$false] %s1450_s30 }
  0x9d   : > { %p1448_p0 = pnand %p1446_p8, %p2335_p10  ;;  %s1452_s23 = scalar_lea.vmem %s1451_s30, 128 }
  0x9e   : > { %p1453_p12 = scmp.lt.s32.totalorder %s288_s16, %s1451_s30  ;;  %p1454_p5 = scmp.lt.s32.totalorder %s1452_s23, %s1445_s3 }
  0x9f   : > { %p1449_p1 = pneg %p1448_p0 }
  0xa0   : > { %p1455_p7 = por %p1454_p5, %p1453_p12 }
  0xa2   : > { %p1456_p9 = pnand %p1455_p7, %p1449_p1 }
  0xa4   : > { %1459 = shalt.err (!%p1456_p9)
}
  0xa5   : > { %1214 = dma.hbm_to_vmem [thread:$0]  (!%p2333_p2), %s2003_s7, 64, %s288_s16, %s277_s25  }
  0xa6   : > { %s2031_s11 = scalar_lea.hbm %s2262_s2, %s1954_s21  ;;  %s315_s1 = scalar_lea.vmem [#allocation8], %s1951_s24 }
  0xa7   : > { %s322_s22 = sshll.u32 %s315_s1, 4  ;;  %s1460_s3 = scalar_lea.hbm %s2031_s11, 256  ;;  %s2034_s22 = int_to_ptr.vmem [resolvable:$true] %s322_s22 }
  0xa8   : > { %p1461_p12 = scmp.ne.s32.totalorder %s2031_s11, %s1460_s3  ;;  %p2336_p5 = scmp.ne.s32.totalorder %s2331_s13, 0 }
  0xa9   : > { %s1465_s16 = scalar_lea.hbm %s2262_s2, 2048  ;;  %p1466_p2 = scmp.lt.u32.totalorder %s2031_s11, %s2262_s2 }
  0xaa   : > { %p1463_p3 = pnand %p1461_p12, %p2336_p5  ;;  %p1467_p4 = scmp.lt.u32.totalorder %s1465_s16, %s1460_s3 }
  0xab   : > { %p1469_p6 = scmp.lt.u32.totalorder %s1460_s3, %s2031_s11 }
  0xac   : > { %p1464_p11 = pneg %p1463_p3  ;;  %p1468_p13 = por %p1467_p4, %p1466_p2 }
  0xae   : > { %p1470_p8 = por %p1469_p6, %p1468_p13 }
  0xb0   : > { %p1471_p10 = pnand %p1470_p8, %p1464_p11 }
  0xb2   : > { %1474 = shalt.err (!%p1471_p10)
}
  0xb3   : > { %s1475_s30 = scalar_lea.vmem %s2034_s22, 256  ;;  %s1700_s23 = smov [#allocation8]  }
  0xb4   : > { %p1476_p0 = scmp.ne.s32.totalorder %s2034_s22, %s1475_s30  ;;  %s1480_s12 = sshll.u32 %s1700_s23, 4  ;;  %s1481_s12 = int_to_ptr.vmem [resolvable:$false] %s1480_s12 }
  0xb5   : > { %s1482_s20 = scalar_lea.vmem %s1481_s12, 512  ;;  %p1483_p9 = scmp.lt.s32.totalorder %s2034_s22, %s1481_s12 }
  0xb6   : > { %p1478_p1 = pnand %p1476_p0, %p2336_p5  ;;  %p1484_p12 = scmp.lt.s32.totalorder %s1482_s20, %s1475_s30 }
  0xb8   : > { %p1479_p7 = pneg %p1478_p1  ;;  %p1485_p3 = por %p1484_p12, %p1483_p9 }
  0xba   : > { %p1486_p2 = pnand %p1485_p3, %p1479_p7 }
  0xbc   : > { %1489 = shalt.err (!%p1486_p2)
}
  0xbd   : > { %p2337_p11 = scmp.ne.s32.totalorder %s2328_s27, 0  ;;  %s2338_s1 = scalar_lea.sflag [#allocation7], %s1896_s17 }
  0xbe   : > { %s2066_s25 = scalar_lea.hbm %s2264_s4, %s1954_s21  ;;  %s357_s16 = scalar_lea.vmem [#allocation11], %s1951_s24 }
  0xbf   : > { %1220 = dma.hbm_to_vmem [thread:$0]  (!%p2337_p11), %s2031_s11, 256, %s2034_s22, %s2338_s1, %s1697_s8, %s1697_s8, %s1698_s29  }
  0xc0   : > { %s364_s7 = sshll.u32 %s357_s16, 4  ;;  %s1490_s14 = scalar_lea.hbm %s2066_s25, 256  ;;  %s2069_s7 = int_to_ptr.vmem [resolvable:$true] %s364_s7 }
  0xc1   : > { %p1491_p4 = scmp.ne.s32.totalorder %s2066_s25, %s1490_s14  ;;  %s1495_s22 = scalar_lea.hbm %s2264_s4, 2048 }
  0xc2   : > { %p1496_p8 = scmp.lt.u32.totalorder %s2066_s25, %s2264_s4  ;;  %p1497_p10 = scmp.lt.u32.totalorder %s1495_s22, %s1490_s14 }
  0xc3   : > { %p1493_p13 = pnand %p1491_p4, %p2336_p5  ;;  %p1499_p1 = scmp.lt.u32.totalorder %s1490_s14, %s2066_s25 }
  0xc4   : > { %p1498_p0 = por %p1497_p10, %p1496_p8 }
  0xc5   : > { %p1494_p6 = pneg %p1493_p13 }
  0xc6   : > { %p1500_p7 = por %p1499_p1, %p1498_p0 }
  0xc8   : > { %p1501_p9 = pnand %p1500_p7, %p1494_p6 }
  0xca   : > { %1504 = shalt.err (!%p1501_p9)
}
  0xcb   : > { %s1505_s24 = scalar_lea.vmem %s2069_s7, 256  ;;  %s1701_s12 = smov [#allocation11]  }
  0xcc   : > { %p1506_p12 = scmp.ne.s32.totalorder %s2069_s7, %s1505_s24  ;;  %s1510_s20 = sshll.u32 %s1701_s12, 4  ;;  %s1511_s20 = int_to_ptr.vmem [resolvable:$false] %s1510_s20 }
  0xcd   : > { %s1512_s1 = scalar_lea.vmem %s1511_s20, 512  ;;  %p1513_p4 = scmp.lt.s32.totalorder %s2069_s7, %s1511_s20 }
  0xce   : > { %p1508_p3 = pnand %p1506_p12, %p2336_p5  ;;  %p1514_p13 = scmp.lt.s32.totalorder %s1512_s1, %s1505_s24 }
  0xd0   : > { %p1509_p2 = pneg %p1508_p3  ;;  %p1515_p8 = por %p1514_p13, %p1513_p4 }
  0xd2   : > { %p1516_p10 = pnand %p1515_p8, %p1509_p2 }
  0xd4   : > { %1519 = shalt.err (!%p1516_p10)
}
  0xd5   : > { %1226 = dma.hbm_to_vmem [thread:$0]  (!%p2337_p11), %s2066_s25, 256, %s2069_s7, %s333_s19, %s1697_s8, %s1697_s8, %s1698_s29  }
  0xd6   : > { %s2339_s3 = sand.u32 1, %s1660_s26   ;;  %s1100_s16 = sshll.u32 %s1684_s9, 5 }
  0xd7   : > { %s1099_s6 = sshll.u32 %s2339_s3, 1  ;;  %s2103_s11 = scalar_lea.hbm %s2265_s5, %s1100_s16 }
  0xd8   : > { %s378_s22 = scalar_lea.vmem [#allocation12], %s1099_s6  ;;  %s375_s21 = scalar_lea.sflag [#allocation13], %s1896_s17 }
  0xd9   : > { %s385_s23 = sshll.u32 %s378_s22, 4  ;;  %s1520_s24 = scalar_lea.hbm %s2103_s11, 32  ;;  %s386_s23 = int_to_ptr.vmem [resolvable:$true] %s385_s23 }
  0xda   : > { %p1521_p6 = scmp.ne.s32.totalorder %s2103_s11, %s1520_s24  ;;  %s1525_s29 = scalar_lea.hbm %s2265_s5, 256 }
  0xdb   : > { %p1526_p7 = scmp.lt.u32.totalorder %s2103_s11, %s2265_s5  ;;  %p1527_p9 = scmp.lt.u32.totalorder %s1525_s29, %s1520_s24 }
  0xdc   : > { %p1523_p0 = pnand %p1521_p6, %p2336_p5  ;;  %p1529_p3 = scmp.lt.u32.totalorder %s1520_s24, %s2103_s11 }
  0xdd   : > { %p1528_p12 = por %p1527_p9, %p1526_p7 }
  0xde   : > { %p1524_p1 = pneg %p1523_p0 }
  0xdf   : > { %p1530_p2 = por %p1529_p3, %p1528_p12 }
  0xe1   : > { %p1531_p4 = pnand %p1530_p2, %p1524_p1 }
  0xe3   : > { %1534 = shalt.err (!%p1531_p4)
}
  0xe4   : > { %s1535_s17 = scalar_lea.vmem %s386_s23, 32  ;;  %s1702_s12 = smov [#allocation12]  }
  0xe5   : > { %p1536_p13 = scmp.ne.s32.totalorder %s386_s23, %s1535_s17  ;;  %s1540_s20 = sshll.u32 %s1702_s12, 4  ;;  %s1541_s20 = int_to_ptr.vmem [resolvable:$false] %s1540_s20 }
  0xe6   : > { %s1542_s1 = scalar_lea.vmem %s1541_s20, 64  ;;  %p1543_p6 = scmp.lt.s32.totalorder %s386_s23, %s1541_s20 }
  0xe7   : > { %p1538_p8 = pnand %p1536_p13, %p2336_p5  ;;  %p1544_p0 = scmp.lt.s32.totalorder %s1542_s1, %s1535_s17 }
  0xe9   : > { %p1539_p10 = pneg %p1538_p8  ;;  %p1545_p11 = por %p1544_p0, %p1543_p6 }
  0xeb   : > { %p1546_p7 = pnand %p1545_p11, %p1539_p10 }
  0xed   : > { %1549 = shalt.err (!%p1546_p7)
}
  0xee   : > { %p2340_p9 = scmp.ne.s32.totalorder %s2328_s27, 0  ;;  %p2341_p1 = scmp.ne.s32.totalorder %s2313_s18, 0 }
  0xef   : > { %s2126_s13 = sand.u32 (!%p2341_p1), 1, %s1668_s28   ;;  %p2342_p5 = scmp.ne.s32.totalorder (!%p2341_p1), %s2308_s15, 0 }
  0xf0   : > { %1229 = dma.hbm_to_vmem [thread:$0]  (!%p2340_p9), %s2103_s11, 32, %s386_s23, %s375_s21  }
  0xf1   : > { %394 = sbr.rel (%p2341_p1) target bundleno = 1509 (0x5e5), region = 48  ;;  %s1102_s3 = sshll.u32 (!%p2341_p1), %s2126_s13, 2 }
  0xf2   : > { %s397_s6 = scalar_lea.sflag (!%p2341_p1), [#allocation4], %s2126_s13  ;;  %s2130_s16 = scalar_lea.vmem (!%p2341_p1), [#allocation3], %s1102_s3 }
  0xf8   : > { %1623 = dma.done.wait (%p2342_p5), %s397_s6, 64  }
  0xf9   : > { %1625 = vsyncadd (%p2342_p5), %s397_s6, 4294967232  ;;  %s2343_s27 = sld [smem:[#allocation29_spill]]  ;;  %s408_s30 = scalar_lea.vmem [#allocation6], %s2126_s13 }
  0xff   : > { %s405_s18 = sand.u32 1, %s2343_s27  }
 0x100   : > { %s406_s14 = scalar_lea.sflag [#allocation7], %s405_s18 }
 0x101   : > { %1627 = dma.done.wait (%p2342_p5), %s406_s14, 16  }
 0x102   : > { %1629 = vsyncadd (%p2342_p5), %s406_s14, 4294967280  ;;  %s2344_s11 = sld [smem:[#allocation23_spill]]  ;;  %s2345_s22 = sld [smem:[#allocation30_spill]] }
 0x108   : > { %s415_s23 = sand.u32 1, %s2344_s11   ;;  %p2346_p11 = scmp.ne.s32.totalorder %s2345_s22, 0 }
 0x109   : > { %s2143_s21 = sshll.u32 %s415_s23, 4 }
 0x10a   : > { %s417_s24 = scalar_lea.vmem [#allocation8], %s2143_s21 }
 0x10b   : > { %1631 = dma.done.wait (%p2346_p11), %s406_s14, 256  }
 0x10c   : > { %1633 = vsyncadd (%p2346_p11), %s406_s14, 4294967040  ;;  %s423_s19 = scalar_lea.sflag [#allocation10], %s405_s18  ;;  %s426_s8 = scalar_lea.vmem [#allocation9], %s2143_s21 }
 0x10d   : > { %1635 = dma.done.wait (%p2346_p11), %s423_s19, 512  }
 0x10e   : > { %1637 = vsyncadd (%p2346_p11), %s423_s19, 4294966784  ;;  %s2155_s15 = sshll.u32 %s415_s23, 1  ;;  %s435_s29 = scalar_lea.vmem [#allocation11], %s2143_s21 }
 0x10f   : > { %s441_s25 = scalar_lea.sflag [#allocation13], %s405_s18  ;;  %s444_s7 = scalar_lea.vmem [#allocation12], %s2155_s15 }
 0x110   : > { %1639 = dma.done.wait (%p2346_p11), %s441_s25, 32  }
 0x111   : > { %1641 = vsyncadd (%p2346_p11), %s441_s25, 4294967264  ;;  %p2347_p12 = scmp.eq.s32.totalorder %s2343_s27, 0 }
 0x113   : > { %1643 = dma.done.wait (%p2347_p12), [#allocation13], 16   ;;  %p2348_p3 = pmov %p2347_p12 }
 0x114   : > { %s1108_s17 = sshll.u32 %s2126_s13, 3  ;;  %v1703_v0 = vmov 0.0   ;;  %vm1704_vm0 = vmmov 0   ;;  %v1332_v1 = vld [vmem:[%s426_s8] sm:$0xff]   ;;  %v1333_v2 = vld [vmem:[%s426_s8 + $0x8] sm:$0xff]   ;;  %vm530_vm1 = vcmask 261120   ;;  %v729_v26 = vlaneseq }
 0x115   : > { %1645 = vsyncadd (%p2348_p3), [#allocation13], 4294967280  ;;  %1155 = vmatprep.subr.bf16.mxu1 %v1703_v0  ;;  %1147 = vmatprep.subr.bf16.mxu0 %v1703_v0  ;;  %v1334_v3 = vld [vmem:[%s417_s24] sm:$0xff]   ;;  %v1335_v4 = vld [vmem:[%s417_s24 + $0x8] sm:$0xff]   ;;  %vm681_vm2 = vcmask 31744   ;;  %vm741_vm3 = vcmask 64512  }
 0x116   : > { %1159 = vmatprep.mubr.msk.bf16.mxu1 %vm1704_vm0, %v1703_v0  ;;  %1151 = vmatprep.mubr.msk.bf16.mxu0 %vm1704_vm0, %v1703_v0  ;;  %v504_v5 = vld [vmem:[%s2130_s16] sm:$0xf]  ;;  %v1336_v17 = vld [vmem:[%s435_s29] sm:$0xff]   ;;  %v730_v28 = vshrl.u32 %v729_v26, 7  ;;  %v732_v29 = vand.u32 127, %v729_v26  ;;  %vm758_vm5 = vcmask 1043456  }
 0x117   : > { %1156 = vmatpush3.bf16.msra.mxu1 %v1332_v1  ;;  %1148 = vmatpush3.bf16.msra.mxu0 %v1334_v3  ;;  %v1337_v18 = vld [vmem:[%s435_s29 + $0x8] sm:$0xff]   ;;  %v517_v41 = vld [vmem:[%s444_s7] sm:$0x3]  ;;  %vm806_vm6 = vcmask 1041408   ;;  %s502_s12 = scalar_lea.vmem [#allocation15], %s1108_s17  ;;  %s2349_s20 = sld [smem:[#allocation26_spill]] }
 0x118   : > { %1157 = vmatprep.subr.bf16.mxu1 %v1703_v0  ;;  %1149 = vmatprep.subr.bf16.mxu0 %v1703_v0  ;;  %v1119_v30 = vld [vmem:[%s408_s30] ss:$0 sm:$0xff]  ;;  %vm733_vm4 = vcmp.eq.s32.totalorder %v730_v28, %v732_v29  ;;  %v808_v42 = vsel %vm806_vm6, %v517_v41, 0 }
 0x119   : > { %v740_v31 = vsel %vm733_vm4, 1.0, %v1119_v30 }
 0x11b   : > { %1158 = vmatpush3.bf16.msra.mxu1 %v1333_v2  ;;  %1150 = vmatpush3.bf16.msra.mxu0 %v1335_v4 }
 0x11c   : > { %1171 = vmatprep.subr.bf16.mxu1 %v1703_v0  ;;  %1163 = vmatprep.subr.bf16.mxu0 %v1703_v0 }
 0x11d   : > { %p1122_p2 = scmp.ne.s32.totalorder %s2349_s20, 0 }
 0x11e   : > { %1160 = vmatmul.mubr.msk.bf16.vlgmr.msra.gmra.mrb[0].mxu1 %vm530_vm1, %v504_v5  ;;  %1152 = vmatmul.mubr.msk.bf16.vlgmr.msra.gmra.mrb[0].mxu0 %vm530_vm1, %v504_v5  ;;  %v1705_v56 = vmov (!%p1122_p2), 0.0  }
 0x11f   : > { %1173 = vmatprep.mubr.msk.bf16.mxu1 %vm1704_vm0, %v1703_v0  ;;  %1167 = vmatprep.mubr.msk.bf16.mxu0 %vm1704_vm0, %v1703_v0  ;;  %854 = vst.msk [vmem:[#allocation2] sm:$0xff] (!%p1122_p2), %vm530_vm1, %v1705_v56 }
 0x120   : > { %1164 = vmatpush3.bf16.msra.mxu0 %v1336_v17 }
 0x121   : > { %1165 = vmatprep.subr.bf16.mxu0 %v1703_v0 }
 0x124   : > { %1166 = vmatpush3.bf16.msra.mxu0 %v1337_v18 }
 0x125   : > { %1177 = vmatprep.subr.bf16.mxu0 %v1703_v0 }
 0x127   : > { %1168 = vmatmul.mubr.msk.bf16.vlgmr.msra.gmra.mrb[4].mxu0 %vm530_vm1, %v504_v5 }
 0x128   : > { %1179 = vmatprep.mubr.msk.bf16.mxu0 %vm1704_vm0, %v1703_v0 }
 0x1f1   : > { %v621_v6 = vpop.f32.mrb[0].mxu1  ;;  %v568_v10 = vpop.f32.mrb[0].mxu0 }
 0x1f2   : > { %v627_v7 = vpack.c.bf16 %v621_v6, %v621_v6  ;;  %v1161_v8 = vpop.f32.mrb[1].mxu1  ;;  %v1153_v13 = vpop.f32.mrb[1].mxu0  ;;  %v574_v16 = vpack.c.bf16 %v568_v10, %v568_v10 }
 0x1f3   : > { %v624_v9 = vpop.f32.mrb[2].mxu1  ;;  %v571_v14 = vpop.f32.mrb[2].mxu0 }
 0x1f4   : > { %v686_v11 = vsel %vm681_vm2, %v627_v7, 0  ;;  %v1162_v12 = vpop.f32.mrb[3].mxu1  ;;  %v1154_v15 = vpop.f32.mrb[3].mxu0 }
 0x1f5   : > { %1172 = vmatpush3.bf16.xpose.msra.mxu1 %v686_v11 }
 0x1f6   : > { %1183 = vmatprep.subr.bf16.mxu1 %v1703_v0 }
 0x1fa   : > { %v674_v35 = vpop.f32.mrb[4].mxu0 }
 0x1fb   : > { %v1169_v36 = vpop.f32.mrb[5].mxu0  ;;  %v680_v39 = vpack.c.bf16 %v674_v35, %v674_v35 }
 0x1fc   : > { %1174 = vmatmul.mubr.msk.bf16.vlgmr.msra.gmra.mrb[4].mxu1 %vm681_vm2, %v574_v16  ;;  %v677_v37 = vpop.f32.mrb[6].mxu0 }
 0x1fd   : > { %1185 = vmatprep.mubr.msk.bf16.mxu1 %vm1704_vm0, %v1703_v0  ;;  %v1170_v38 = vpop.f32.mrb[7].mxu0  ;;  %v760_v40 = vsel %vm758_vm5, %v680_v39, 0  ;;  %1184 = vmatpush3.bf16.msra.mxu1 %v808_v42 }
 0x1fe   : > { %1178 = vmatpush3.bf16.msra.mxu0 %v760_v40 }
 0x2cf   : > { %v722_v19 = vpop.f32.mrb[4].mxu1 }
 0x2d0   : > { %v1175_v20 = vpop.f32.mrb[5].mxu1  ;;  %v742_v21 = vsel %vm741_vm3, %v722_v19, -inf }
 0x2d1   : > { %743 = vmax.xlane.f32.xlu0 %v742_v21  ;;  %v725_v22 = vpop.f32.mrb[6].mxu1 }
 0x2d2   : > { %v1176_v23 = vpop.f32.mrb[7].mxu1 }
 0x35e   : > { %v744_v24 = vpop.xlane.xlu0 %743 }
 0x35f   : > { %v745_v25 = vsub.f32 %v722_v19, %v744_v24 }
 0x361   : > { %v746_v27 = vmul.f32 1.442695, %v745_v25 }
 0x363   : > { %1338 = vpow2.f32 %v746_v27 }
 0x36d   : > { %v1339_v32 = vpop.eup %1338 }
 0x36e   : > { %v748_v33 = vmul.f32 %v1339_v32, %v740_v31 }
 0x370   : > { %v749_v34 = vsel %vm741_vm3, %v748_v33, 0.0 }
 0x371   : > { %750 = vadd.xlane.f32.xlu0 %v749_v34 }
 0x3fe   : > { %v751_v43 = vpop.xlane.xlu0 %750 }
 0x3ff   : > { %1340 = vrcp.f32 %v751_v43 }
 0x409   : > { %v1341_v44 = vpop.eup %1340 }
 0x40a   : > { %v753_v45 = vmul.f32 %v1341_v44, %v748_v33 }
 0x40c   : > { %v754_v46 = vpack.c.bf16 %v753_v45, %v753_v45 }
 0x40e   : > { %1180 = vmatmul.mubr.msk.bf16.vlgmr.msra.gmra.mrb[8].mxu0 %vm741_vm3, %v754_v46 }
 0x4e1   : > { %v796_v47 = vpop.f32.mrb[8].mxu0 }
 0x4e2   : > { %v802_v48 = vpack.c.bf16 %v796_v47, %v796_v47  ;;  %v1181_v49 = vpop.f32.mrb[9].mxu0 }
 0x4e3   : > { %v799_v50 = vpop.f32.mrb[10].mxu0 }
 0x4e4   : > { %v1182_v51 = vpop.f32.mrb[11].mxu0  ;;  %1186 = vmatmul.mubr.msk.bf16.vlgmr.msra.gmra.mrb[8].mxu1 %vm681_vm2, %v802_v48 }
 0x5b4   : > { %853 = sbr.rel (%p1122_p2) target bundleno = 1467 (0x5bb), region = 80 }
 0x5b7   : > { %v844_v52 = vpop.f32.mrb[8].mxu1 }
 0x5b8   : > { %v1187_v53 = vpop.f32.mrb[9].mxu1 }
 0x5b9   : > { %v847_v54 = vpop.f32.mrb[10].mxu1 }
 0x5ba   : > { %v1188_v55 = vpop.f32.mrb[11].mxu1 }
 0x5bb PF: > { %v855_v57 = vld [vmem:[#allocation2] sm:$0xff]  ;;  %s2350_s1 = sld [smem:[#allocation26_spill]] }
 0x5bc   : > { %v856_v58 = vadd.f32 %v855_v57, %v844_v52 }
 0x5be   : > { %857 = vst.msk [vmem:[#allocation2] sm:$0xff] %vm530_vm1, %v856_v58 }
 0x5c1   : > { %p1123_p4 = scmp.ne.s32.totalorder %s2350_s1, 7 }
 0x5c2   : > { %v1124_v60 = vld [vmem:[#allocation14] ss:$0 sm:$0xff] (!%p1123_p4) }
 0x5c3   : > { %861 = sbr.rel (%p1123_p4) target bundleno = 1482 (0x5ca), region = 84 }
 0x5c5   : > { %v862_v59 = vld [vmem:[#allocation2] sm:$0xff] (!%p1123_p4) }
 0x5c6   : > { %v870_v61 = vadd.f32 (!%p1123_p4), %v1124_v60, %v862_v59 }
 0x5c8   : > { %871 = vst.msk [vmem:[%s502_s12] sm:$0xff] (!%p1123_p4), %vm530_vm1, %v870_v61 }
 0x5ca PF: > { %s2351_s3 = sld [smem:[#allocation27_spill]]  ;;  %s2352_s6 = sld [smem:[#allocation35_spill]] }
 0x5cb   : > { %s2353_s14 = sld [smem:[#allocation40_spill]]  ;;  %s886_s11 = sshll.u32 %s502_s12, 4  ;;  %s887_s11 = int_to_ptr.vmem [resolvable:$true] %s886_s11 }
 0x5cc   : > { %s873_s22 = scalar_lea.sflag [#allocation5], %s2126_s13  ;;  %s1550_s23 = scalar_lea.vmem %s887_s11, 128 }
 0x5cd   : > { %p1551_p13 = scmp.ne.s32.totalorder %s887_s11, %s1550_s23  ;;  %s1706_s21 = smov [#allocation15]  }
 0x5ce   : > { %s1554_s24 = sshll.u32 %s1706_s21, 4  ;;  %s1555_s24 = int_to_ptr.vmem [resolvable:$false] %s1554_s24 }
 0x5cf   : > { %s1556_s19 = scalar_lea.vmem %s1555_s24, 256  ;;  %p1557_p0 = scmp.lt.s32.totalorder %s887_s11, %s1555_s24 }
 0x5d0   : > { %s1126_s16 = sshll.u32 %s2351_s3, 7  ;;  %p2354_p8 = scmp.ne.s32.totalorder %s2352_s6, 0 }
 0x5d1   : > { %s2203_s30 = scalar_lea.hbm %s2353_s14, %s1126_s16  ;;  %p1558_p7 = scmp.lt.s32.totalorder %s1556_s19, %s1550_s23 }
 0x5d2   : > { %p1552_p10 = pnand %p1551_p13, %p2354_p8 }
 0x5d3   : > { %p1559_p9 = por %p1558_p7, %p1557_p0 }
 0x5d4   : > { %p1553_p6 = pneg %p1552_p10 }
 0x5d6   : > { %p1560_p1 = pnand %p1559_p9, %p1553_p6 }
 0x5d8   : > { %1563 = shalt.err (!%p1560_p1)
}
 0x5d9   : > { %s1564_s13 = scalar_lea.hbm %s2203_s30, 128  ;;  %s1568_s29 = scalar_lea.hbm %s2353_s14, 256 }
 0x5da   : > { %p1565_p5 = scmp.ne.s32.totalorder %s2203_s30, %s1564_s13  ;;  %p1569_p3 = scmp.lt.u32.totalorder %s2203_s30, %s2353_s14 }
 0x5db   : > { %p1570_p2 = scmp.lt.u32.totalorder %s1568_s29, %s1564_s13  ;;  %p1572_p13 = scmp.lt.u32.totalorder %s1564_s13, %s2203_s30 }
 0x5dc   : > { %p1566_p11 = pnand %p1565_p5, %p2354_p8 }
 0x5dd   : > { %p1571_p4 = por %p1570_p2, %p1569_p3 }
 0x5de   : > { %p1567_p12 = pneg %p1566_p11 }
 0x5df   : > { %p1573_p10 = por %p1572_p13, %p1571_p4 }
 0x5e1   : > { %p1574_p6 = pnand %p1573_p10, %p1567_p12 }
 0x5e3   : > { %1577 = shalt.err (!%p1574_p6)
}
 0x5e4   : > { %1205 = dma.vmem_to_hbm [thread:$0]  (%p2354_p8), %s887_s11, 128, %s2203_s30, %s873_s22  }
 0x5e5 PF: > { %s2355_s17 = sld [smem:[#allocation28_spill]]  ;;  %s2356_s12 = sld [smem:[#allocation24_spill]] }
 0x5e6   : > { %s2357_s20 = sld [smem:[#allocation31_spill]] }
 0x5eb   : > { %p1237_p0 = scmp.ge.s32.totalorder %s2355_s17, 2  ;;  %s898_s1 = sand.u32 1, %s2356_s12  }
 0x5ec   : > { %p2358_p7 = scmp.ne.s32.totalorder %s2357_s20, 0  ;;  %s899_s3 = scalar_lea.sflag [#allocation5], %s898_s1 }
 0x5ee   : > { %p1231_p9 = pnand %p1237_p0, %p2358_p7 }
 0x5f0   : > { %1647 = dma.done.wait (!%p1231_p9), %s899_s3, 128  }
 0x5f1   : > { %1649 = vsyncadd (!%p1231_p9), %s899_s3, 4294967168  ;;  %s32_s11 = sadd.s32 1, %s2355_s17   ;;  %s2359_s24 = sld [smem:[#allocation23_spill]] }
 0x5f2   : > { %p29_p1 = scmp.ge.s32.totalorder %s32_s11, 18   ;;  %s2360_s16 = sld [smem:[#allocation34_spill]] }
 0x5f3   : > { %s2361_s6 = sld [smem:[#allocation25_spill]]  ;;  %s2362_s29 = sld [smem:[#allocation36_spill]] }
 0x5f4   : > { %s2363_s18 = sld [smem:[#allocation32_spill]]  ;;  %s2364_s22 = sld [smem:[#allocation33_spill]] }
 0x5f5   : > { %s2365_s25 = smov %s1660_s26  ;;  %s2367_s27 = smov %s1668_s28 }
 0x5f6   : > { %s2369_s30 = smov %s1684_s9  ;;  %s2370_s8 = smov %s1688_s10 }
 0x5f7   :  { %31 = sbr.rel (!%p29_p1) target bundleno = 20 (0x14), region = 166 }
 0x5f8   : > { %s2366_s26 = smov %s2360_s16 }
 0x5f9   : > { %s2368_s28 = smov %s2361_s6 }
 0x5fa   : > { %s2371_s9 = smov %s2363_s18  ;;  %s2372_s10 = smov %s2364_s22 }
 0x5fe   :  { %904 = vsyncpa [#allocation4], 1 }
 0x5ff   :  { %906 = vsyncpa [#allocation4 + $0x1], 1 }
 0x600   :  { %907 = vsyncpa [#allocation7], 1 }
 0x601   :  { %909 = vsyncpa [#allocation7 + $0x1], 1 }
 0x602   :  { %910 = vsyncpa [#allocation10], 1 }
 0x603   :  { %912 = vsyncpa [#allocation10 + $0x1], 1 }
 0x604   :  { %913 = vsyncpa [#allocation13], 1 }
 0x605   :  { %915 = vsyncpa [#allocation13 + $0x1], 1 }
 0x606   :  { %916 = vsyncpa [#allocation5], 1 }
 0x607   :  { %918 = vsyncpa [#allocation5 + $0x1], 1 }

</bundles_post_ra>
